<compile_context>
chip_gen: v7x
topology: tpu7x:2x2x1
jax: 0.10.0
libtpu: 0.0.40
codegen_flags: <defaults>
</compile_context>

<pallas_src>
import jax
import jax.numpy as jnp
from jax.experimental import pallas as pl
from jax.experimental.pallas import tpu as pltpu

input_dim = 2
hidden_dim = 4
output_dim = 1

LANES = 128
PACK = 1024  # 8 sublanes * 128 lanes of f32: full-vreg batch-packing granularity


def _sigmoid(z):
    # sigmoid(z) == 0.5 * tanh(z / 2) + 0.5 : a single EUP transcendental
    # instead of exp + divide.
    return 0.5 * jnp.tanh(0.5 * z) + 0.5


def _mlp_kernel(xT_ref, w1_ref, b1_ref, w2_ref, b2_ref, outT_ref):
    """One batch tile.

    xT_ref:   (in_d,  tb//128, 128)   VMEM   (batch packed on sublanes+lanes)
    w1_ref:   (in_d,  hidden_dim)     SMEM
    b1_ref:   (1,     hidden_dim)     SMEM
    w2_ref:   (hidden_dim, out_d)     SMEM
    b2_ref:   (1,     out_d)          SMEM
    outT_ref: (out_d, tb//128, 128)   VMEM
    """
    in_d, hid_d = w1_ref.shape
    out_d = w2_ref.shape[1]

    # Each input feature as a full (tb//128, 128) slab -> dense vregs.
    x_rows = [xT_ref[i] for i in range(in_d)]

    # fc1 + sigmoid: h_j = sigmoid(sum_i w1[i,j] * x_i + b1[j])
    # Scalar-broadcast FMAs on the VPU (scalars from SMEM), tanh on the EUP.
    h_rows = []
    for j in range(hid_d):
        z = w1_ref[0, j] * x_rows[0] + b1_ref[0, j]
        for i in range(1, in_d):
            z = z + w1_ref[i, j] * x_rows[i]
        h_rows.append(_sigmoid(z))

    # fc2 + sigmoid: y_o = sigmoid(sum_j w2[j,o] * h_j + b2[o])
    for o in range(out_d):
        y = w2_ref[0, o] * h_rows[0] + b2_ref[0, o]
        for j in range(1, hid_d):
            y = y + w2_ref[j, o] * h_rows[j]
        outT_ref[o] = _sigmoid(y).astype(outT_ref.dtype)


def simple_nn_forward(x, w1, b1, w2, b2, *, block_b=256 * 1024):
    """Pallas forward pass of SimpleNN.

    x:  (B, input_dim)            float32
    w1: (input_dim, hidden_dim)   float32   (transpose of PyTorch fc1.weight)
    b1: (1, hidden_dim)           float32
    w2: (hidden_dim, output_dim)  float32   (transpose of PyTorch fc2.weight)
    b2: (1, output_dim)           float32
    returns (B, output_dim) float32
    """
    B, in_d = x.shape
    out_d = w2.shape[1]

    # Batch tile: multiple of 1024 so the packed (tb//128, 128) block keeps its
    # last two dims (8, 128)-aligned; capped at block_b (~256K samples -> ~6 MiB
    # double-buffered VMEM, safe under default scoped limits on v5e/v6e/v7x).
    b_pad = pl.cdiv(B, PACK) * PACK
    tb = min(block_b, b_pad)
    # If everything would land in a single tile but there is enough work,
    # split into >= 2 grid steps so "parallel" can use both v7x TensorCores.
    if tb == b_pad and b_pad >= 2 * PACK:
        tb = pl.cdiv(b_pad // 2, PACK) * PACK
    b_pad = pl.cdiv(B, tb) * tb
    grid = (b_pad // tb,)

    # Batch on the lane axis, then packed onto sublanes: (in_d, b_pad//128, 128).
    xT = jnp.swapaxes(x, 0, 1)                       # (in_d, B)
    if b_pad != B:
        xT = jnp.pad(xT, ((0, 0), (0, b_pad - B)))   # padded lanes are discarded
    xT = xT.reshape(in_d, b_pad // LANES, LANES)

    smem = pl.BlockSpec(memory_space=pltpu.MemorySpace.SMEM)

    outT = pl.pallas_call(
        _mlp_kernel,
        out_shape=jax.ShapeDtypeStruct((out_d, b_pad // LANES, LANES), jnp.float32),
        grid=grid,
        in_specs=[
            pl.BlockSpec((in_d, tb // LANES, LANES), lambda i: (0, i, 0)),
            smem,   # w1
            smem,   # b1
            smem,   # w2
            smem,   # b2
        ],
        out_specs=pl.BlockSpec((out_d, tb // LANES, LANES), lambda i: (0, i, 0)),
        compiler_params=pltpu.CompilerParams(
            dimension_semantics=("parallel",),  # megacore sharding on v7x
        ),
    )(xT, w1, b1, w2, b2)

    return outT.reshape(out_d, b_pad)[:, :B].T


def xavier_uniform(key, fan_in, fan_out):
    bound = jnp.sqrt(6.0 / (fan_in + fan_out))
    # PyTorch weight is (out, in); we store its transpose (in, out).
    return jax.random.uniform(
        key, (fan_in, fan_out), dtype=jnp.float32, minval=-bound, maxval=bound
    )


def linear_bias_init(key, fan_in, fan_out):
    # PyTorch nn.Linear default bias init: U(-1/sqrt(fan_in), 1/sqrt(fan_in))
    bound = 1.0 / jnp.sqrt(float(fan_in))
    return jax.random.uniform(
        key, (1, fan_out), dtype=jnp.float32, minval=-bound, maxval=bound
    )


def reference_forward(x, w1, b1, w2, b2):
    h = jax.nn.sigmoid(x @ w1 + b1)
    return jax.nn.sigmoid(h @ w2 + b2)


if __name__ == "__main__":
    key = jax.random.PRNGKey(0)
    k_x, k_w1, k_b1, k_w2, k_b2 = jax.random.split(key, 5)

    batch = 8
    x = jax.random.normal(k_x, (batch, input_dim), dtype=jnp.float32)

    w1 = xavier_uniform(k_w1, input_dim, hidden_dim)
    b1 = linear_bias_init(k_b1, input_dim, hidden_dim)
    w2 = xavier_uniform(k_w2, hidden_dim, output_dim)
    b2 = linear_bias_init(k_b2, hidden_dim, output_dim)

    out = simple_nn_forward(x, w1, b1, w2, b2)
    out = jax.block_until_ready(out)

    ref = reference_forward(x, w1, b1, w2, b2)
    assert out.shape == (batch, output_dim)
    assert jnp.allclose(out, ref, atol=1e-5, rtol=1e-5)

    print("KERNEL_OK")
</pallas_src>

<mosaic_0001>
module attributes {stable_mosaic.version = 11 : i64} {
  func.func @_mlp_kernel(%arg0: i32, %arg1: memref<2x8x128xf32, #tpu.memory_space<vmem>>, %arg2: memref<2x4xf32, #tpu.memory_space<smem>>, %arg3: memref<1x4xf32, #tpu.memory_space<smem>>, %arg4: memref<4x1xf32, #tpu.memory_space<smem>>, %arg5: memref<1x1xf32, #tpu.memory_space<smem>>, %arg6: memref<1x8x128xf32, #tpu.memory_space<vmem>>) attributes {dimension_semantics = [#tpu.dimension_semantics<parallel>], iteration_bounds = array<i64: 1>, scalar_prefetch = 0 : i64, scratch_operands = 0 : i64, tpu.core_type = #tpu.core_type<tc>, window_params = [{transform_indices = @transform_0, window_bounds = array<i64: 2, 8, 128>}, {transform_indices = @transform_1, window_bounds = array<i64: 2, 4>}, {transform_indices = @transform_2, window_bounds = array<i64: 1, 4>}, {transform_indices = @transform_3, window_bounds = array<i64: 4, 1>}, {transform_indices = @transform_4, window_bounds = array<i64: 1, 1>}, {transform_indices = @transform_5, window_bounds = array<i64: 1, 8, 128>}]} {
    %c0 = arith.constant 0 : index
    %c0_0 = arith.constant 0 : index
    %c0_1 = arith.constant 0 : index
    %0 = vector.load %arg1[%c0, %c0_0, %c0_1] : memref<2x8x128xf32, #tpu.memory_space<vmem>>, vector<1x8x128xf32>
    %1 = vector.shape_cast %0 : vector<1x8x128xf32> to vector<8x128xf32>
    %c1 = arith.constant 1 : index
    %c0_2 = arith.constant 0 : index
    %c0_3 = arith.constant 0 : index
    %2 = vector.load %arg1[%c1, %c0_2, %c0_3] : memref<2x8x128xf32, #tpu.memory_space<vmem>>, vector<1x8x128xf32>
    %3 = vector.shape_cast %2 : vector<1x8x128xf32> to vector<8x128xf32>
    %c0_4 = arith.constant 0 : index
    %c0_5 = arith.constant 0 : index
    %4 = memref.load %arg2[%c0_4, %c0_5] : memref<2x4xf32, #tpu.memory_space<smem>>
    %5 = vector.broadcast %4 : f32 to vector<8x128xf32>
    %6 = arith.mulf %5, %1 : vector<8x128xf32>
    %c0_6 = arith.constant 0 : index
    %c0_7 = arith.constant 0 : index
    %7 = memref.load %arg3[%c0_6, %c0_7] : memref<1x4xf32, #tpu.memory_space<smem>>
    %8 = vector.broadcast %7 : f32 to vector<8x128xf32>
    %9 = arith.addf %6, %8 : vector<8x128xf32>
    %c1_8 = arith.constant 1 : index
    %c0_9 = arith.constant 0 : index
    %10 = memref.load %arg2[%c1_8, %c0_9] : memref<2x4xf32, #tpu.memory_space<smem>>
    %11 = vector.broadcast %10 : f32 to vector<8x128xf32>
    %12 = arith.mulf %11, %3 : vector<8x128xf32>
    %13 = arith.addf %9, %12 : vector<8x128xf32>
    %cst = arith.constant 5.000000e-01 : f32
    %14 = vector.broadcast %cst : f32 to vector<8x128xf32>
    %15 = arith.mulf %14, %13 : vector<8x128xf32>
    %16 = math.tanh %15 : vector<8x128xf32>
    %cst_10 = arith.constant 5.000000e-01 : f32
    %17 = vector.broadcast %cst_10 : f32 to vector<8x128xf32>
    %18 = arith.mulf %17, %16 : vector<8x128xf32>
    %cst_11 = arith.constant 5.000000e-01 : f32
    %19 = vector.broadcast %cst_11 : f32 to vector<8x128xf32>
    %20 = arith.addf %18, %19 : vector<8x128xf32>
    %c0_12 = arith.constant 0 : index
    %c1_13 = arith.constant 1 : index
    %21 = memref.load %arg2[%c0_12, %c1_13] : memref<2x4xf32, #tpu.memory_space<smem>>
    %22 = vector.broadcast %21 : f32 to vector<8x128xf32>
    %23 = arith.mulf %22, %1 : vector<8x128xf32>
    %c0_14 = arith.constant 0 : index
    %c1_15 = arith.constant 1 : index
    %24 = memref.load %arg3[%c0_14, %c1_15] : memref<1x4xf32, #tpu.memory_space<smem>>
    %25 = vector.broadcast %24 : f32 to vector<8x128xf32>
    %26 = arith.addf %23, %25 : vector<8x128xf32>
    %c1_16 = arith.constant 1 : index
    %c1_17 = arith.constant 1 : index
    %27 = memref.load %arg2[%c1_16, %c1_17] : memref<2x4xf32, #tpu.memory_space<smem>>
    %28 = vector.broadcast %27 : f32 to vector<8x128xf32>
    %29 = arith.mulf %28, %3 : vector<8x128xf32>
    %30 = arith.addf %26, %29 : vector<8x128xf32>
    %cst_18 = arith.constant 5.000000e-01 : f32
    %31 = vector.broadcast %cst_18 : f32 to vector<8x128xf32>
    %32 = arith.mulf %31, %30 : vector<8x128xf32>
    %33 = math.tanh %32 : vector<8x128xf32>
    %cst_19 = arith.constant 5.000000e-01 : f32
    %34 = vector.broadcast %cst_19 : f32 to vector<8x128xf32>
    %35 = arith.mulf %34, %33 : vector<8x128xf32>
    %cst_20 = arith.constant 5.000000e-01 : f32
    %36 = vector.broadcast %cst_20 : f32 to vector<8x128xf32>
    %37 = arith.addf %35, %36 : vector<8x128xf32>
    %c0_21 = arith.constant 0 : index
    %c2 = arith.constant 2 : index
    %38 = memref.load %arg2[%c0_21, %c2] : memref<2x4xf32, #tpu.memory_space<smem>>
    %39 = vector.broadcast %38 : f32 to vector<8x128xf32>
    %40 = arith.mulf %39, %1 : vector<8x128xf32>
    %c0_22 = arith.constant 0 : index
    %c2_23 = arith.constant 2 : index
    %41 = memref.load %arg3[%c0_22, %c2_23] : memref<1x4xf32, #tpu.memory_space<smem>>
    %42 = vector.broadcast %41 : f32 to vector<8x128xf32>
    %43 = arith.addf %40, %42 : vector<8x128xf32>
    %c1_24 = arith.constant 1 : index
    %c2_25 = arith.constant 2 : index
    %44 = memref.load %arg2[%c1_24, %c2_25] : memref<2x4xf32, #tpu.memory_space<smem>>
    %45 = vector.broadcast %44 : f32 to vector<8x128xf32>
    %46 = arith.mulf %45, %3 : vector<8x128xf32>
    %47 = arith.addf %43, %46 : vector<8x128xf32>
    %cst_26 = arith.constant 5.000000e-01 : f32
    %48 = vector.broadcast %cst_26 : f32 to vector<8x128xf32>
    %49 = arith.mulf %48, %47 : vector<8x128xf32>
    %50 = math.tanh %49 : vector<8x128xf32>
    %cst_27 = arith.constant 5.000000e-01 : f32
    %51 = vector.broadcast %cst_27 : f32 to vector<8x128xf32>
    %52 = arith.mulf %51, %50 : vector<8x128xf32>
    %cst_28 = arith.constant 5.000000e-01 : f32
    %53 = vector.broadcast %cst_28 : f32 to vector<8x128xf32>
    %54 = arith.addf %52, %53 : vector<8x128xf32>
    %c0_29 = arith.constant 0 : index
    %c3 = arith.constant 3 : index
    %55 = memref.load %arg2[%c0_29, %c3] : memref<2x4xf32, #tpu.memory_space<smem>>
    %56 = vector.broadcast %55 : f32 to vector<8x128xf32>
    %57 = arith.mulf %56, %1 : vector<8x128xf32>
    %c0_30 = arith.constant 0 : index
    %c3_31 = arith.constant 3 : index
    %58 = memref.load %arg3[%c0_30, %c3_31] : memref<1x4xf32, #tpu.memory_space<smem>>
    %59 = vector.broadcast %58 : f32 to vector<8x128xf32>
    %60 = arith.addf %57, %59 : vector<8x128xf32>
    %c1_32 = arith.constant 1 : index
    %c3_33 = arith.constant 3 : index
    %61 = memref.load %arg2[%c1_32, %c3_33] : memref<2x4xf32, #tpu.memory_space<smem>>
    %62 = vector.broadcast %61 : f32 to vector<8x128xf32>
    %63 = arith.mulf %62, %3 : vector<8x128xf32>
    %64 = arith.addf %60, %63 : vector<8x128xf32>
    %cst_34 = arith.constant 5.000000e-01 : f32
    %65 = vector.broadcast %cst_34 : f32 to vector<8x128xf32>
    %66 = arith.mulf %65, %64 : vector<8x128xf32>
    %67 = math.tanh %66 : vector<8x128xf32>
    %cst_35 = arith.constant 5.000000e-01 : f32
    %68 = vector.broadcast %cst_35 : f32 to vector<8x128xf32>
    %69 = arith.mulf %68, %67 : vector<8x128xf32>
    %cst_36 = arith.constant 5.000000e-01 : f32
    %70 = vector.broadcast %cst_36 : f32 to vector<8x128xf32>
    %71 = arith.addf %69, %70 : vector<8x128xf32>
    %c0_37 = arith.constant 0 : index
    %c0_38 = arith.constant 0 : index
    %72 = memref.load %arg4[%c0_37, %c0_38] : memref<4x1xf32, #tpu.memory_space<smem>>
    %73 = vector.broadcast %72 : f32 to vector<8x128xf32>
    %74 = arith.mulf %73, %20 : vector<8x128xf32>
    %c0_39 = arith.constant 0 : index
    %c0_40 = arith.constant 0 : index
    %75 = memref.load %arg5[%c0_39, %c0_40] : memref<1x1xf32, #tpu.memory_space<smem>>
    %76 = vector.broadcast %75 : f32 to vector<8x128xf32>
    %77 = arith.addf %74, %76 : vector<8x128xf32>
    %c1_41 = arith.constant 1 : index
    %c0_42 = arith.constant 0 : index
    %78 = memref.load %arg4[%c1_41, %c0_42] : memref<4x1xf32, #tpu.memory_space<smem>>
    %79 = vector.broadcast %78 : f32 to vector<8x128xf32>
    %80 = arith.mulf %79, %37 : vector<8x128xf32>
    %81 = arith.addf %77, %80 : vector<8x128xf32>
    %c2_43 = arith.constant 2 : index
    %c0_44 = arith.constant 0 : index
    %82 = memref.load %arg4[%c2_43, %c0_44] : memref<4x1xf32, #tpu.memory_space<smem>>
    %83 = vector.broadcast %82 : f32 to vector<8x128xf32>
    %84 = arith.mulf %83, %54 : vector<8x128xf32>
    %85 = arith.addf %81, %84 : vector<8x128xf32>
    %c3_45 = arith.constant 3 : index
    %c0_46 = arith.constant 0 : index
    %86 = memref.load %arg4[%c3_45, %c0_46] : memref<4x1xf32, #tpu.memory_space<smem>>
    %87 = vector.broadcast %86 : f32 to vector<8x128xf32>
    %88 = arith.mulf %87, %71 : vector<8x128xf32>
    %89 = arith.addf %85, %88 : vector<8x128xf32>
    %cst_47 = arith.constant 5.000000e-01 : f32
    %90 = vector.broadcast %cst_47 : f32 to vector<8x128xf32>
    %91 = arith.mulf %90, %89 : vector<8x128xf32>
    %92 = math.tanh %91 : vector<8x128xf32>
    %cst_48 = arith.constant 5.000000e-01 : f32
    %93 = vector.broadcast %cst_48 : f32 to vector<8x128xf32>
    %94 = arith.mulf %93, %92 : vector<8x128xf32>
    %cst_49 = arith.constant 5.000000e-01 : f32
    %95 = vector.broadcast %cst_49 : f32 to vector<8x128xf32>
    %96 = arith.addf %94, %95 : vector<8x128xf32>
    %c0_50 = arith.constant 0 : index
    %c0_51 = arith.constant 0 : index
    %c0_52 = arith.constant 0 : index
    %97 = vector.load %arg6[%c0_50, %c0_51, %c0_52] : memref<1x8x128xf32, #tpu.memory_space<vmem>>, vector<1x8x128xf32>
    %98 = vector.shape_cast %97 : vector<1x8x128xf32> to vector<8x128xf32>
    %99 = vector.shape_cast %96 : vector<8x128xf32> to vector<1x8x128xf32>
    tpu.vector_store %arg6[%c0_50, %c0_51, %c0_52], %99 {strides = array<i32>} : memref<1x8x128xf32, #tpu.memory_space<vmem>>, vector<1x8x128xf32>,
    return
  }
  func.func @transform_0(%arg0: i32) -> (i32, i32, i32) {
    %c0_i32 = arith.constant 0 : i32
    %c0_i32_0 = arith.constant 0 : i32
    %c0_i32_1 = arith.constant 0 : i32
    return %c0_i32, %arg0, %c0_i32_0 : i32, i32, i32
  }
  func.func @transform_1(%arg0: i32) -> (i32, i32) {
    %c0_i32 = arith.constant 0 : i32
    %c0_i32_0 = arith.constant 0 : i32
    %c0_i32_1 = arith.constant 0 : i32
    return %c0_i32, %c0_i32_0 : i32, i32
  }
  func.func @transform_2(%arg0: i32) -> (i32, i32) {
    %c0_i32 = arith.constant 0 : i32
    %c0_i32_0 = arith.constant 0 : i32
    %c0_i32_1 = arith.constant 0 : i32
    return %c0_i32, %c0_i32_0 : i32, i32
  }
  func.func @transform_3(%arg0: i32) -> (i32, i32) {
    %c0_i32 = arith.constant 0 : i32
    %c0_i32_0 = arith.constant 0 : i32
    %c0_i32_1 = arith.constant 0 : i32
    return %c0_i32, %c0_i32_0 : i32, i32
  }
  func.func @transform_4(%arg0: i32) -> (i32, i32) {
    %c0_i32 = arith.constant 0 : i32
    %c0_i32_0 = arith.constant 0 : i32
    %c0_i32_1 = arith.constant 0 : i32
    return %c0_i32, %c0_i32_0 : i32, i32
  }
  func.func @transform_5(%arg0: i32) -> (i32, i32, i32) {
    %c0_i32 = arith.constant 0 : i32
    %c0_i32_0 = arith.constant 0 : i32
    %c0_i32_1 = arith.constant 0 : i32
    return %c0_i32, %arg0, %c0_i32_0 : i32, i32, i32
  }
}

</mosaic_0001>

<bundles_post_ra>
// kernel: tpu_custom_call.1
= control target key start
LH: loop header
LB: loop body
LE: loop exit
PB: predicated region body
PF: predicated region fallthrough
CT: control target
= control target key end

     0   :  { %11 = vsyncpa [#allocation4], 0  ;;  %s362_s0 = inlined_call_operand.hbm [shape: f32[2,8,128], index: 0, kind: input, shape index: {}]   ;;  %s363_s1 = inlined_call_operand.vmem [shape: f32[2,4], index: 1, kind: input, shape index: {}]   ;;  %s364_s2 = inlined_call_operand.vmem [shape: f32[1,4], index: 2, kind: input, shape index: {}]   ;;  %s365_s3 = inlined_call_operand.vmem [shape: f32[4,1], index: 3, kind: input, shape index: {}]   ;;  %s366_s4 = inlined_call_operand.<no memory space> [shape: f32[1,1], index: 4, kind: input, shape index: {}]   ;;  %s367_s5 = inlined_call_operand.hbm [shape: f32[1,8,128], index: 5, kind: output, shape index: {}]  }
   0x1   :  { %12 = vsyncpa [#allocation6], 0 }
   0x2   :  { %13 = vsyncpa [#allocation9], 0  ;;  %s43_s20 = sshll.u32 %s364_s2, 4  ;;  %s44_s20 = int_to_ptr.vmem [resolvable:$true] %s43_s20 }
   0x3   :  { %14 = vsyncpa [#allocation5], 0  ;;  %s201_s21 = scalar_lea.vmem %s44_s20, 16  ;;  %p206_p1 = scmp.lt.s32.totalorder %s44_s20, %s44_s20 }
   0x4   :  { %p202_p0 = scmp.ne.s32.totalorder %s44_s20, %s201_s21  ;;  %p207_p2 = scmp.lt.s32.totalorder %s201_s21, %s201_s21 }
   0x6   :  { %p208_p3 = por %p207_p2, %p206_p1 }
   0x8   :  { %p209_p4 = pnand %p208_p3, %p202_p0 }
   0xa   :  { %212 = shalt.err (!%p209_p4)
}
   0xb   :  { %s289_s22 = smov [#allocation8]   ;;  %s290_s23 = smov [#allocation3]  }
   0xc   :  { %46 = dma.vmem_to_smem %s44_s20, 16, %s289_s22, [#allocation9]  }
   0xd   :  { %s20_s24 = sshll.u32 %s290_s23, 4  ;;  %s213_s27 = scalar_lea.hbm %s362_s0, 256  ;;  %s21_s24 = int_to_ptr.vmem [resolvable:$true] %s20_s24 }
   0xe   :  { %p214_p5 = scmp.ne.s32.totalorder %s362_s0, %s213_s27  ;;  %p217_p6 = scmp.lt.u32.totalorder %s213_s27, %s362_s0 }
  0x10   :  { %p219_p7 = pnand %p217_p6, %p214_p5 }
  0x12   :  { %222 = shalt.err (!%p219_p7)
}
  0x13   :  { %s223_s6 = scalar_lea.vmem %s21_s24, 256  ;;  %p228_p9 = scmp.lt.s32.totalorder %s21_s24, %s21_s24 }
  0x14   :  { %p224_p8 = scmp.ne.s32.totalorder %s21_s24, %s223_s6  ;;  %p229_p10 = scmp.lt.s32.totalorder %s223_s6, %s223_s6 }
  0x16   :  { %p230_p11 = por %p229_p10, %p228_p9 }
  0x18   :  { %p231_p12 = pnand %p230_p11, %p224_p8 }
  0x1a   :  { %234 = shalt.err (!%p231_p12)
}
  0x1b   :  { %s291_s7 = smov 128   ;;  %s292_s8 = smov 8  }
  0x1c   :  { %26 = dma.hbm_to_vmem [thread:$0]  %s362_s0, 256, %s21_s24, [#allocation4], %s291_s7, %s291_s7, %s292_s8  }
  0x1d   :  { %s33_s13 = sshll.u32 %s363_s1, 4  ;;  %s53_s16 = sshll.u32 %s365_s3, 4  ;;  %s34_s13 = int_to_ptr.vmem [resolvable:$true] %s33_s13  ;;  %s54_s16 = int_to_ptr.vmem [resolvable:$true] %s53_s16 }
  0x1e   :  { %s235_s17 = scalar_lea.vmem %s34_s13, 32  ;;  %p240_p0 = scmp.lt.s32.totalorder %s34_s13, %s34_s13 }
  0x1f   :  { %p236_p13 = scmp.ne.s32.totalorder %s34_s13, %s235_s17  ;;  %p241_p1 = scmp.lt.s32.totalorder %s235_s17, %s235_s17 }
  0x21   :  { %p242_p2 = por %p241_p1, %p240_p0 }
  0x23   :  { %p243_p3 = pnand %p242_p2, %p236_p13 }
  0x25   :  { %246 = shalt.err (!%p243_p3)
}
  0x26   :  { %s293_s18 = smov [#allocation7]   ;;  %s247_s0 = scalar_lea.vmem %s54_s16, 64 }
  0x27   :  { %36 = dma.vmem_to_smem %s34_s13, 32, %s293_s18, [#allocation6]  }
  0x28   :  { %p248_p4 = scmp.ne.s32.totalorder %s54_s16, %s247_s0  ;;  %p252_p5 = scmp.lt.s32.totalorder %s54_s16, %s54_s16 }
  0x29   :  { %p253_p6 = scmp.lt.s32.totalorder %s247_s0, %s247_s0 }
  0x2b   :  { %p254_p7 = por %p253_p6, %p252_p5 }
  0x2d   :  { %p255_p8 = pnand %p254_p7, %p248_p4 }
  0x2f   :  { %258 = shalt.err (!%p255_p8)
}
  0x30   :  { %s294_s1 = smov [#allocation10]  }
  0x31   :  { %56 = dma.vmem_to_smem %s54_s16, 64, %s294_s1, [#allocation9]  }
  0x32   :  { %281 = dma.done.wait [#allocation4], 256  }
  0x33   :  { %282 = vsyncadd [#allocation4], 4294967040 }
  0x34   :  { %283 = dma.done.wait [#allocation6], 32  }
  0x35   :  { %284 = vsyncadd [#allocation6], 4294967264 }
  0x36   :  { %285 = dma.done.wait [#allocation9], 80  }
  0x37   :  { %286 = vsyncadd [#allocation9], 4294967216 }
  0x38   :  { %71 = sfence }
  0x39   :  { %s75_s3 = sld [smem:[#allocation7]]  ;;  %s172_s21 = sld [smem:[#allocation7 + $0x1]]  ;;  %v72_v0 = vld [vmem:[#allocation3] sm:$0xff]  ;;  %v74_v1 = vld [vmem:[#allocation3 + $0x8] sm:$0xff]  ;;  %v135_v45 = vstv %s366_s4 }
  0x3a   :  { %s78_s19 = sld [smem:[#allocation8]]  ;;  %s173_s22 = sld [smem:[#allocation8 + $0x1]] }
  0x3b   :  { %s171_s20 = sld [smem:[#allocation7 + $0x80]]  ;;  %s174_s23 = sld [smem:[#allocation7 + $0x81]] }
  0x3c   :  { %s175_s24 = sld [smem:[#allocation7 + $0x2]]  ;;  %s178_s27 = sld [smem:[#allocation7 + $0x3]] }
  0x3d   :  { %s176_s25 = sld [smem:[#allocation8 + $0x2]]  ;;  %s179_s28 = sld [smem:[#allocation8 + $0x3]] }
  0x3e   :  { %s177_s26 = sld [smem:[#allocation7 + $0x82]]  ;;  %s180_s2 = sld [smem:[#allocation7 + $0x83]] }
  0x3f   :  { %v76_v2 = vstv %s75_s3  ;;  %v90_v6 = vstv %s172_s21  ;;  %s131_s29 = sld [smem:[#allocation10]]  ;;  %s295_s10 = smov [#allocation11]  }
  0x40   :  { %v79_v3 = vstv %s78_s19  ;;  %v77_v4 = vmul.f32 %v76_v2, %v72_v0  ;;  %v91_v8 = vmul.f32 %v90_v6, %v72_v0  ;;  %v93_v9 = vstv %s173_s22  ;;  %s181_s30 = sld [smem:[#allocation10 + $0x80]]  ;;  %s160_s11 = sshll.u32 %s295_s10, 4  ;;  %s161_s11 = int_to_ptr.vmem [resolvable:$true] %s160_s11 }
  0x41   :  { %v82_v5 = vstv %s171_s20  ;;  %v96_v10 = vstv %s174_s23  ;;  %s182_s6 = sld [smem:[#allocation10 + $0x100]]  ;;  %s259_s4 = scalar_lea.vmem %s161_s11, 128 }
  0x42   :  { %v83_v7 = vmul.f32 %v82_v5, %v74_v1  ;;  %v80_v11 = vadd.f32 %v79_v3, %v77_v4  ;;  %v97_v12 = vmul.f32 %v96_v10, %v74_v1  ;;  %v104_v13 = vstv %s175_s24  ;;  %s183_s7 = sld [smem:[#allocation10 + $0x180]]  ;;  %p260_p9 = scmp.ne.s32.totalorder %s161_s11, %s259_s4 }
  0x43   :  { %v107_v14 = vstv %s176_s25  ;;  %v94_v15 = vadd.f32 %v93_v9, %v91_v8  ;;  %v105_v16 = vmul.f32 %v104_v13, %v72_v0  ;;  %v118_v18 = vstv %s178_s27  ;;  %p264_p10 = scmp.lt.s32.totalorder %s161_s11, %s161_s11  ;;  %p265_p11 = scmp.lt.s32.totalorder %s259_s4, %s259_s4 }
  0x44   :  { %v110_v17 = vstv %s177_s26  ;;  %v84_v19 = vadd.f32 %v83_v7, %v80_v11  ;;  %v119_v21 = vmul.f32 %v118_v18, %v72_v0  ;;  %v121_v22 = vstv %s179_s28 }
  0x45   :  { %v111_v20 = vmul.f32 %v110_v17, %v74_v1  ;;  %v98_v23 = vadd.f32 %v97_v12, %v94_v15  ;;  %v108_v24 = vadd.f32 %v107_v14, %v105_v16  ;;  %v124_v25 = vstv %s180_s2  ;;  %p266_p12 = por %p265_p11, %p264_p10 }
  0x46   :  { %v85_v26 = vmul.f32 0.5, %v84_v19  ;;  %v122_v27 = vadd.f32 %v121_v22, %v119_v21  ;;  %v125_v28 = vmul.f32 %v124_v25, %v74_v1  ;;  %v132_v38 = vstv %s131_s29 }
  0x47   :  { %v99_v29 = vmul.f32 0.5, %v98_v23  ;;  %v112_v30 = vadd.f32 %v111_v20, %v108_v24  ;;  %v138_v41 = vstv %s181_s30  ;;  %v142_v48 = vstv %s182_s6  ;;  %p267_p13 = pnand %p266_p12, %p260_p9 }
  0x48   :  { %191 = vtanh.f32 %v85_v26  ;;  %v126_v31 = vadd.f32 %v125_v28, %v122_v27  ;;  %v146_v51 = vstv %s183_s7 }
  0x49   :  { %193 = vtanh.f32 %v99_v29  ;;  %v113_v32 = vmul.f32 0.5, %v112_v30 }
  0x4a   :  { %v127_v33 = vmul.f32 0.5, %v126_v31 }
  0x4b   :  { %195 = vtanh.f32 %v113_v32 }
  0x4c   :  { %197 = vtanh.f32 %v127_v33 }
  0x52   :  { %v192_v34 = vpop.eup %191 }
  0x53   :  { %v194_v35 = vpop.eup %193  ;;  %v87_v36 = vmul.f32 0.5, %v192_v34 }
  0x54   :  { %v101_v37 = vmul.f32 0.5, %v194_v35 }
  0x55   :  { %v196_v39 = vpop.eup %195  ;;  %v88_v40 = vadd.f32 0.5, %v87_v36 }
  0x56   :  { %v198_v42 = vpop.eup %197  ;;  %v102_v43 = vadd.f32 0.5, %v101_v37  ;;  %v115_v44 = vmul.f32 0.5, %v196_v39 }
  0x57   :  { %v129_v46 = vmul.f32 0.5, %v198_v42  ;;  %v133_v47 = vmul.f32 %v132_v38, %v88_v40 }
  0x58   :  { %v116_v49 = vadd.f32 0.5, %v115_v44  ;;  %v139_v50 = vmul.f32 %v138_v41, %v102_v43 }
  0x59   :  { %v130_v52 = vadd.f32 0.5, %v129_v46  ;;  %v136_v53 = vadd.f32 %v135_v45, %v133_v47 }
  0x5a   :  { %v143_v54 = vmul.f32 %v142_v48, %v116_v49 }
  0x5b   :  { %v140_v55 = vadd.f32 %v139_v50, %v136_v53  ;;  %v147_v56 = vmul.f32 %v146_v51, %v130_v52 }
  0x5d   :  { %v144_v57 = vadd.f32 %v143_v54, %v140_v55 }
  0x5f   :  { %v148_v58 = vadd.f32 %v147_v56, %v144_v57 }
  0x61   :  { %v149_v59 = vmul.f32 0.5, %v148_v58 }
  0x63   :  { %199 = vtanh.f32 %v149_v59 }
  0x6d   :  { %v200_v60 = vpop.eup %199 }
  0x6e   :  { %v151_v61 = vmul.f32 0.5, %v200_v60 }
  0x70   :  { %v152_v62 = vadd.f32 0.5, %v151_v61 }
  0x72   :  { %153 = vst [vmem:[#allocation11] sm:$0xff] %v152_v62 }
  0x73   :  { %270 = shalt.err (!%p267_p13)
}
  0x74   :  { %s271_s14 = scalar_lea.hbm %s367_s5, 128 }
  0x75   :  { %p272_p0 = scmp.ne.s32.totalorder %s367_s5, %s271_s14  ;;  %p275_p1 = scmp.lt.u32.totalorder %s271_s14, %s367_s5 }
  0x77   :  { %p277_p2 = pnand %p275_p1, %p272_p0 }
  0x79   :  { %280 = shalt.err (!%p277_p2)
}
  0x7a   :  { %163 = dma.vmem_to_hbm [thread:$0]  %s161_s11, 128, %s367_s5, [#allocation5]  }
  0x7b   :  { %287 = dma.done.wait [#allocation5], 128  }
  0x7c   :  { %288 = vsyncadd [#allocation5], 4294967168 }
  0x7d   :  { %167 = vsyncpa [#allocation4], 1 }
  0x7e   :  { %168 = vsyncpa [#allocation5], 1 }
  0x7f   :  { %169 = vsyncpa [#allocation6], 1 }
  0x80   :  { %170 = vsyncpa [#allocation9], 1 }

</bundles_post_ra>
